<compile_context>
chip_gen: v7x
topology: tpu7x:2x2x1
jax: 0.10.0
libtpu: 0.0.40
codegen_flags: <defaults>
</compile_context>

<pallas_src>
import jax
import jax.numpy as jnp
from jax import lax
from jax.experimental import pallas as pl
from jax.experimental.pallas import tpu as pltpu

F32 = jnp.float32
BF16 = jnp.bfloat16
VMEM_LIMIT = 32 * 1024 * 1024  # explicit: > v5e's 16MiB default, safe on v7x 64MiB

ENC_PARAM_ORDER = ("enc_w1", "enc_b1", "enc_w2", "enc_b2", "gru_wi", "gru_bi")
HEAD_PARAM_ORDER = ("head_w1", "head_b1", "head_w2", "head_b2")
MIXER_PARAM_ORDER = ("w1s", "w1a", "b1", "w2", "b2", "w3", "b3",
                     "w4t", "vw1", "vb1", "vw2t", "bout")


def bdot(a, w):
    """MXU matmul with bf16 operands and f32 accumulation (2-3x f32 MXU)."""
    return jnp.dot(a.astype(BF16), w.astype(BF16), preferred_element_type=F32)


def _round_up(x, m):
    return ((x + m - 1) // m) * m


def _pick_row_tile(rows, max_tile=512):
    # multiple of 16 (bf16 sublane packing); boundary blocks are masked by Pallas.
    return min(max_tile, _round_up(rows, 16))


def _const_specs(weights):
    return [pl.BlockSpec(w.shape, lambda *args, nd=w.ndim: (0,) * nd) for w in weights]


def _cparams(sem):
    return pltpu.CompilerParams(dimension_semantics=sem, vmem_limit_bytes=VMEM_LIMIT)


# ----------------------------------------------------------------------------
# Kernel 1: FC encoder + input-side GRU gate projection (big-M, parallel rows)
# ----------------------------------------------------------------------------
def _encoder_kernel(x_ref, w1_ref, b1_ref, w2_ref, b2_ref, wi_ref, bi_ref, gi_ref):
    x = x_ref[...]                                            # (tile, obs) bf16
    e = jnp.maximum(bdot(x, w1_ref[...]) + b1_ref[...], 0.0)  # f32
    e = jnp.maximum(bdot(e, w2_ref[...]) + b2_ref[...], 0.0)
    # fused input-side gate projection: [r|z|n] in one (H, 3H) matmul
    gi_ref[...] = bdot(e, wi_ref[...]) + bi_ref[...]          # (tile, 3H) f32


def encoder_forward(x2d, params):
    """x2d: (R, obs) bf16 -> gi: (R, 3H) f32 pre-activation input gates."""
    R, N = x2d.shape
    H3 = params["gru_wi"].shape[-1]
    tile = _pick_row_tile(R)
    weights = [params[k] for k in ENC_PARAM_ORDER]
    return pl.pallas_call(
        _encoder_kernel,
        grid=(pl.cdiv(R, tile),),
        in_specs=[pl.BlockSpec((tile, N), lambda i: (i, 0))] + _const_specs(weights),
        out_specs=pl.BlockSpec((tile, H3), lambda i: (i, 0)),
        out_shape=jax.ShapeDtypeStruct((R, H3), F32),
        compiler_params=_cparams(("parallel",)),
    )(x2d, *weights)


# ----------------------------------------------------------------------------
# Kernel 2: GRU recurrence (BA-sharded "parallel" x T-chunk "arbitrary")
# ----------------------------------------------------------------------------
def _gru_kernel(gi_ref, h0_ref, wh_ref, bh_ref, hid_ref, hout_ref):
    t_chunk, ba_s, H3 = gi_ref.shape
    H = hout_ref.shape[-1]

    @pl.when(pl.program_id(1) == 0)
    def _():
        hout_ref[...] = h0_ref[...]       # hout_ref is the persistent h carry

    # hoisted out of the timestep loop (weights cast once, broadcast once)
    wh_b = wh_ref[...].astype(BF16)                       # (H, 3H)
    bh = jnp.broadcast_to(bh_ref[...], (ba_s, H3))        # (ba_s, 3H)

    h = hout_ref[...]                                     # f32, register-carried
    for i in range(t_chunk):                              # static, fully unrolled
        gh = jnp.dot(h.astype(BF16), wh_b, preferred_element_type=F32) + bh
        gi = gi_ref[i]                                    # (ba_s, 3H) f32
        r = jax.nn.sigmoid(gi[:, 0:H] + gh[:, 0:H])
        z = jax.nn.sigmoid(gi[:, H:2 * H] + gh[:, H:2 * H])
        n = jnp.tanh(gi[:, 2 * H:3 * H] + r * gh[:, 2 * H:3 * H])
        h = (1.0 - z) * n + z * h
        hid_ref[i] = h.astype(hid_ref.dtype)              # bf16 hidden slab
    hout_ref[...] = h                                     # single store per chunk


def _pick_t_chunk(T, max_chunk=32):
    best = 1
    for c in range(1, min(T, max_chunk) + 1):
        if T % c == 0:
            best = c
    return best


def gru_forward(gi, h0, params, T, BA):
    """gi: (T*BA, 3H) f32, h0: (BA, H) -> hid (T*BA, H) bf16, h_next (BA, H) f32."""
    H = h0.shape[-1]
    gi3 = gi.reshape(T, BA, 3 * H)                 # free row-major re-view
    # v7x: shard the independent BA sequences across the two TensorCores.
    n_shards = 2 if (BA % 32 == 0) else 1          # keep bf16 block sublanes legal
    ba_s = BA // n_shards
    t_chunk = _pick_t_chunk(T)
    n_chunks = T // t_chunk
    wh, bh = params["gru_wh"], params["gru_bh"]
    hid, h_next = pl.pallas_call(
        _gru_kernel,
        grid=(n_shards, n_chunks),
        in_specs=[pl.BlockSpec((t_chunk, ba_s, 3 * H), lambda s, c: (c, s, 0)),
                  pl.BlockSpec((ba_s, H), lambda s, c: (s, 0)),
                  pl.BlockSpec(wh.shape, lambda s, c: (0, 0)),
                  pl.BlockSpec(bh.shape, lambda s, c: (0, 0))],
        out_specs=[pl.BlockSpec((t_chunk, ba_s, H), lambda s, c: (c, s, 0)),
                   pl.BlockSpec((ba_s, H), lambda s, c: (s, 0))],
        out_shape=(jax.ShapeDtypeStruct((T, BA, H), BF16),
                   jax.ShapeDtypeStruct((BA, H), F32)),
        compiler_params=_cparams(("parallel", "arbitrary")),
    )(gi3, h0, wh, bh)
    return hid.reshape(T * BA, H), h_next


# ----------------------------------------------------------------------------
# Kernel 3: discrete head + fused action-mask / row-max (parallel rows)
# ----------------------------------------------------------------------------
def _head_kernel(hid_ref, mask_ref, w1_ref, b1_ref, w2_ref, b2_ref,
                 logit_ref, qact_ref):
    h = hid_ref[...]                                          # (tile, H) bf16
    hd = jnp.maximum(bdot(h, w1_ref[...]) + b1_ref[...], 0.0)
    logits = bdot(hd, w2_ref[...]) + b2_ref[...]              # (tile, P) f32
    masked = jnp.where(mask_ref[...] == 0.0, -9999999.0, logits)
    logit_ref[...] = masked
    # gather(argmax(masked)) == row max of masked logits
    qact_ref[...] = jnp.max(masked, axis=-1, keepdims=True)


def head_forward(hid2d, mask2d, params):
    """hid2d: (R, H) bf16, mask2d: (R, P) -> masked logits (R, P), q_act (R, 1)."""
    R, H = hid2d.shape
    P = params["head_w2"].shape[-1]
    tile = _pick_row_tile(R)
    weights = [params[k] for k in HEAD_PARAM_ORDER]
    return pl.pallas_call(
        _head_kernel,
        grid=(pl.cdiv(R, tile),),
        in_specs=[pl.BlockSpec((tile, H), lambda i: (i, 0)),
                  pl.BlockSpec((tile, P), lambda i: (i, 0))] + _const_specs(weights),
        out_specs=[pl.BlockSpec((tile, P), lambda i: (i, 0)),
                   pl.BlockSpec((tile, 1), lambda i: (i, 0))],
        out_shape=(jax.ShapeDtypeStruct((R, P), F32),
                   jax.ShapeDtypeStruct((R, 1), F32)),
        compiler_params=_cparams(("parallel",)),
    )(hid2d, mask2d, *weights)


# ----------------------------------------------------------------------------
# Kernel 4: MixerStar (row-tiled, parallel; N=1 projections on VPU+XLU)
# ----------------------------------------------------------------------------
def _mixer_star_kernel(st_ref, aq_ref,
                       w1s, w1a, b1, w2, b2, w3, b3,
                       w4t, vw1, vb1, vw2t, bout,
                       out_ref):
    st = st_ref[...]                                   # (tile, state_dim)
    aq = aq_ref[...]                                   # (tile, agent_num)
    # cat([states, agent_qs], dim=1) @ W1  ==  st @ W1[:M] + aq @ W1[M:]
    h = jnp.maximum(bdot(st, w1s[...]) + bdot(aq, w1a[...]) + b1[...], 0.0)
    h = jnp.maximum(bdot(h, w2[...]) + b2[...], 0.0)
    h = jnp.maximum(bdot(h, w3[...]) + b3[...], 0.0)
    # 1-column output projections: VPU multiply + lane reduce (keep MXU free).
    adv = jnp.sum(h * w4t[...], axis=-1, keepdims=True)
    v = jnp.maximum(bdot(st, vw1[...]) + vb1[...], 0.0)
    vs = jnp.sum(v * vw2t[...], axis=-1, keepdims=True)
    out_ref[...] = adv + vs + bout[...]                # bout = b4 + vb2, folded


def mixer_star_forward(agent_qs, states, params, max_row_tile=256):
    """agent_qs: (TB, A), states: (TB, M) -> q_tot (TB, 1)."""
    TB, A = agent_qs.shape
    M = states.shape[-1]
    tile = min(max_row_tile, _round_up(TB, 8))
    weights = [params[k] for k in MIXER_PARAM_ORDER]
    return pl.pallas_call(
        _mixer_star_kernel,
        grid=(pl.cdiv(TB, tile),),
        in_specs=[pl.BlockSpec((tile, M), lambda i: (i, 0)),
                  pl.BlockSpec((tile, A), lambda i: (i, 0))] + _const_specs(weights),
        out_specs=pl.BlockSpec((tile, 1), lambda i: (i, 0)),
        out_shape=jax.ShapeDtypeStruct((TB, 1), F32),
        compiler_params=_cparams(("parallel",)),
    )(states, agent_qs, *weights)


# ----------------------------------------------------------------------------
# Parameter init (deterministic, synthetic; GRU gates fused host-side)
# ----------------------------------------------------------------------------
def _linear(key, fan_in, fan_out):
    kw, kb = jax.random.split(key)
    bound = 1.0 / float(fan_in) ** 0.5
    w = jax.random.uniform(kw, (fan_in, fan_out), F32, -bound, bound)
    b = jax.random.uniform(kb, (1, fan_out), F32, -bound, bound)
    return w, b


def init_drqn_params(key, obs_shape, hidden_size_list, action_shape):
    h1, H = hidden_size_list[0], hidden_size_list[-1]
    keys = jax.random.split(key, 10)
    p = {}
    p["enc_w1"], p["enc_b1"] = _linear(keys[0], obs_shape, h1)
    p["enc_w2"], p["enc_b2"] = _linear(keys[1], h1, H)
    wir, bir = _linear(keys[2], H, H)
    wiz, biz = _linear(keys[3], H, H)
    win, bin_ = _linear(keys[4], H, H)
    whr, bhr = _linear(keys[5], H, H)
    whz, bhz = _linear(keys[6], H, H)
    whn, bhn = _linear(keys[7], H, H)
    # fused [r|z|n] gate weights: (H, 3H) / (1, 3H)
    p["gru_wi"] = jnp.concatenate([wir, wiz, win], axis=1)
    p["gru_bi"] = jnp.concatenate([bir, biz, bin_], axis=1)
    p["gru_wh"] = jnp.concatenate([whr, whz, whn], axis=1)
    p["gru_bh"] = jnp.concatenate([bhr, bhz, bhn], axis=1)
    p["head_w1"], p["head_b1"] = _linear(keys[8], H, H)
    p["head_w2"], p["head_b2"] = _linear(keys[9], H, action_shape)
    return p


def init_mixer_star_params(key, agent_num, state_dim, embed_dim=256):
    keys = jax.random.split(key, 6)
    p = {}
    w1, p["b1"] = _linear(keys[0], state_dim + agent_num, embed_dim)
    p["w1s"], p["w1a"] = w1[:state_dim], w1[state_dim:]
    p["w2"], p["b2"] = _linear(keys[1], embed_dim, embed_dim)
    p["w3"], p["b3"] = _linear(keys[2], embed_dim, embed_dim)
    w4, b4 = _linear(keys[3], embed_dim, 1)
    p["vw1"], p["vb1"] = _linear(keys[4], state_dim, embed_dim)
    vw2, vb2 = _linear(keys[5], embed_dim, 1)
    p["w4t"] = jnp.transpose(w4)          # (1, E) row layout for VPU mul + reduce
    p["vw2t"] = jnp.transpose(vw2)        # (1, E)
    p["bout"] = b4 + vb2                  # (1, 1) folded output bias
    return p


# ----------------------------------------------------------------------------
# WQMix forward (q_star=True branch, Pallas-backed)
# ----------------------------------------------------------------------------
def wqmix_forward(data, params, single_step=True, q_star=True):
    if not q_star:
        # TODO(synk): q_star=False branch needs the Qmix hypernetwork Mixer,
        # whose definition is not provided with this module.
        raise NotImplementedError("q_star=False (Qmix hyper-mixer) not implemented")

    agent_state = data["obs"]["agent_state"]
    global_state = data["obs"]["global_state"]
    prev_state = data["prev_state"]            # (B, A, H) array (stands in for list-of-lists)
    action_mask = data["obs"]["action_mask"]
    action = data.get("action", None)

    if single_step:
        agent_state = agent_state[None]
        global_state = global_state[None]

    T, B, A, N = agent_state.shape
    M = global_state.shape[-1]
    H = prev_state.shape[-1]
    BA = B * A
    P = params["drqn_star"]["head_w2"].shape[-1]

    # encoder (bf16 input halves DMA; dot operands are bf16 anyway)
    x2d = agent_state.reshape(T * BA, N).astype(BF16)
    gi = encoder_forward(x2d, params["drqn_star"])                    # (T*BA, 3H)
    hid2d, h_next = gru_forward(gi, prev_state.reshape(BA, H),
                                params["drqn_star"], T, BA)           # (T*BA, H) bf16

    am = action_mask if action_mask.ndim == 4 else action_mask[None]
    if action is None:
        mask2d = am.reshape(T * BA, P).astype(F32)
    else:
        mask2d = jnp.ones((T * BA, P), F32)   # no masking when action is provided

    logits2d, qact2d = head_forward(hid2d, mask2d, params["drqn_star"])
    agent_q = logits2d.reshape(T, B, A, P)

    if action is None:
        agent_q_act = qact2d.reshape(T, B, A)          # fused mask + max in-kernel
    else:
        agent_q_act = jnp.take_along_axis(agent_q, action[..., None], axis=-1)[..., 0]

    q_tot = mixer_star_forward(
        agent_q_act.reshape(T * B, A), global_state.reshape(T * B, M),
        params["mixer_star"]
    ).reshape(T, B)

    next_state = h_next.reshape(B, A, H)       # list_split(next_state, step=A) equivalent

    if single_step:
        q_tot, agent_q = q_tot[0], agent_q[0]

    return {"total_q": q_tot, "logit": agent_q, "next_state": next_state,
            "action_mask": action_mask}


# ----------------------------------------------------------------------------
# Precision-matched pure-JAX reference (same bf16-operand matmuls, f32 accum)
# ----------------------------------------------------------------------------
def _drqn_ref(x, h0, p):
    H = h0.shape[-1]

    def step(h, xt):
        e = jax.nn.relu(bdot(xt, p["enc_w1"]) + p["enc_b1"])
        e = jax.nn.relu(bdot(e, p["enc_w2"]) + p["enc_b2"])
        gi = bdot(e, p["gru_wi"]) + p["gru_bi"]
        gh = bdot(h, p["gru_wh"]) + p["gru_bh"]
        r = jax.nn.sigmoid(gi[:, :H] + gh[:, :H])
        z = jax.nn.sigmoid(gi[:, H:2 * H] + gh[:, H:2 * H])
        n = jnp.tanh(gi[:, 2 * H:] + r * gh[:, 2 * H:])
        h_new = (1.0 - z) * n + z * h
        hd = jax.nn.relu(bdot(h_new, p["head_w1"]) + p["head_b1"])
        return h_new, bdot(hd, p["head_w2"]) + p["head_b2"]

    h_final, logits = lax.scan(step, h0, x)
    return logits, h_final


def _mixer_star_ref(aq, st, p):
    h = jax.nn.relu(bdot(st, p["w1s"]) + bdot(aq, p["w1a"]) + p["b1"])
    h = jax.nn.relu(bdot(h, p["w2"]) + p["b2"])
    h = jax.nn.relu(bdot(h, p["w3"]) + p["b3"])
    adv = jnp.sum(h * p["w4t"], axis=-1, keepdims=True)
    v = jax.nn.relu(bdot(st, p["vw1"]) + p["vb1"])
    vs = jnp.sum(v * p["vw2t"], axis=-1, keepdims=True)
    return adv + vs + p["bout"]


def wqmix_forward_ref(data, params, single_step=True):
    agent_state = data["obs"]["agent_state"]
    global_state = data["obs"]["global_state"]
    prev_state = data["prev_state"]
    action_mask = data["obs"]["action_mask"]
    if single_step:
        agent_state, global_state = agent_state[None], global_state[None]
    T, B, A, N = agent_state.shape
    M = global_state.shape[-1]
    H = prev_state.shape[-1]
    logits, h_next = _drqn_ref(agent_state.reshape(T, B * A, N),
                               prev_state.reshape(B * A, H), params["drqn_star"])
    agent_q = logits.reshape(T, B, A, -1)
    am = action_mask if action_mask.ndim == 4 else action_mask[None]
    agent_q = jnp.where(am == 0.0, -9999999.0, agent_q)
    action = jnp.argmax(agent_q, axis=-1)
    agent_q_act = jnp.take_along_axis(agent_q, action[..., None], axis=-1)[..., 0]
    q_tot = _mixer_star_ref(agent_q_act.reshape(T * B, A),
                            global_state.reshape(T * B, M),
                            params["mixer_star"]).reshape(T, B)
    next_state = h_next.reshape(B, A, H)
    if single_step:
        q_tot, agent_q = q_tot[0], agent_q[0]
    return {"total_q": q_tot, "logit": agent_q, "next_state": next_state}


# ----------------------------------------------------------------------------
if __name__ == "__main__":
    T, B, A = 4, 2, 4
    obs_shape, global_obs_shape, action_shape = 16, 32, 8
    hidden_size_list = [32, 64]
    H = hidden_size_list[-1]

    key = jax.random.PRNGKey(0)
    k_param, k_data = jax.random.split(key)
    kq, km = jax.random.split(k_param)
    kd = jax.random.split(k_data, 4)

    params = {
        "drqn_star": init_drqn_params(kq, obs_shape, hidden_size_list, action_shape),
        "mixer_star": init_mixer_star_params(km, A, global_obs_shape, 256),
    }

    agent_state = jax.random.normal(kd[0], (T, B, A, obs_shape), F32)
    global_state = jax.random.normal(kd[1], (T, B, global_obs_shape), F32)
    prev_state = 0.1 * jax.random.normal(kd[2], (B, A, H), F32)
    action_mask = (jax.random.uniform(kd[3], (T, B, A, action_shape)) > 0.3).astype(F32)
    action_mask = action_mask.at[..., 0].set(1.0)  # ensure >=1 valid action per agent

    data = {
        "obs": {"agent_state": agent_state,
                "global_state": global_state,
                "action_mask": action_mask},
        "prev_state": prev_state,
    }

    out = wqmix_forward(data, params, single_step=False, q_star=True)
    jax.block_until_ready(out)

    ref = wqmix_forward_ref(data, params, single_step=False)
    assert out["total_q"].shape == (T, B)
    assert out["logit"].shape == (T, B, A, action_shape)
    assert out["next_state"].shape == (B, A, H)
    assert jnp.allclose(out["total_q"], ref["total_q"], rtol=1e-2, atol=1e-2)
    assert jnp.allclose(out["logit"], ref["logit"], rtol=1e-2, atol=1e-2)
    assert jnp.allclose(out["next_state"], ref["next_state"], rtol=1e-2, atol=1e-2)

    print("KERNEL_OK")
</pallas_src>

<mosaic_0001>
module attributes {stable_mosaic.version = 11 : i64} {
  func.func @_encoder_kernel(%arg0: i32, %arg1: memref<32x16xbf16, #tpu.memory_space<vmem>>, %arg2: memref<16x32xf32, #tpu.memory_space<vmem>>, %arg3: memref<1x32xf32, #tpu.memory_space<vmem>>, %arg4: memref<32x64xf32, #tpu.memory_space<vmem>>, %arg5: memref<1x64xf32, #tpu.memory_space<vmem>>, %arg6: memref<64x192xf32, #tpu.memory_space<vmem>>, %arg7: memref<1x192xf32, #tpu.memory_space<vmem>>, %arg8: memref<32x192xf32, #tpu.memory_space<vmem>>) attributes {dimension_semantics = [#tpu.dimension_semantics<parallel>], iteration_bounds = array<i64: 1>, scalar_prefetch = 0 : i64, scratch_operands = 0 : i64, tpu.core_type = #tpu.core_type<tc>, window_params = [{transform_indices = @transform_0, window_bounds = array<i64: 32, 16>}, {pipeline_mode = #tpu.pipeline_mode<synchronous>, transform_indices = @transform_1, window_bounds = array<i64: 16, 32>}, {pipeline_mode = #tpu.pipeline_mode<synchronous>, transform_indices = @transform_2, window_bounds = array<i64: 1, 32>}, {pipeline_mode = #tpu.pipeline_mode<synchronous>, transform_indices = @transform_3, window_bounds = array<i64: 32, 64>}, {pipeline_mode = #tpu.pipeline_mode<synchronous>, transform_indices = @transform_4, window_bounds = array<i64: 1, 64>}, {pipeline_mode = #tpu.pipeline_mode<synchronous>, transform_indices = @transform_5, window_bounds = array<i64: 64, 192>}, {pipeline_mode = #tpu.pipeline_mode<synchronous>, transform_indices = @transform_6, window_bounds = array<i64: 1, 192>}, {transform_indices = @transform_7, window_bounds = array<i64: 32, 192>}]} {
    %c0 = arith.constant 0 : index
    %c0_0 = arith.constant 0 : index
    %0 = vector.load %arg1[%c0, %c0_0] : memref<32x16xbf16, #tpu.memory_space<vmem>>, vector<32x16xbf16>
    %c0_1 = arith.constant 0 : index
    %c0_2 = arith.constant 0 : index
    %1 = vector.load %arg2[%c0_1, %c0_2] : memref<16x32xf32, #tpu.memory_space<vmem>>, vector<16x32xf32>
    %2 = arith.truncf %1 : vector<16x32xf32> to vector<16x32xbf16>
    %cst = arith.constant dense<0.000000e+00> : vector<32x32xf32>
    %3 = tpu.matmul %0, %2, %cst {dimension_numbers = #tpu.dot_dimension_numbers<[1], [0], [0], [1], [0, 0, 1, 1], [], []>} : vector<32x16xbf16>, vector<16x32xbf16>, vector<32x32xf32> -> vector<32x32xf32>
    %c0_3 = arith.constant 0 : index
    %c0_4 = arith.constant 0 : index
    %4 = vector.load %arg3[%c0_3, %c0_4] : memref<1x32xf32, #tpu.memory_space<vmem>>, vector<1x32xf32>
    %5 = vector.broadcast %4 : vector<1x32xf32> to vector<32x32xf32>
    %6 = arith.addf %3, %5 : vector<32x32xf32>
    %cst_5 = arith.constant 0.000000e+00 : f32
    %7 = vector.broadcast %cst_5 : f32 to vector<32x32xf32>
    %8 = arith.maximumf %6, %7 : vector<32x32xf32>
    %c0_6 = arith.constant 0 : index
    %c0_7 = arith.constant 0 : index
    %9 = vector.load %arg4[%c0_6, %c0_7] : memref<32x64xf32, #tpu.memory_space<vmem>>, vector<32x64xf32>
    %10 = arith.truncf %8 : vector<32x32xf32> to vector<32x32xbf16>
    %11 = arith.truncf %9 : vector<32x64xf32> to vector<32x64xbf16>
    %cst_8 = arith.constant dense<0.000000e+00> : vector<32x64xf32>
    %12 = tpu.matmul %10, %11, %cst_8 {dimension_numbers = #tpu.dot_dimension_numbers<[1], [0], [0], [1], [0, 0, 1, 1], [], []>} : vector<32x32xbf16>, vector<32x64xbf16>, vector<32x64xf32> -> vector<32x64xf32>
    %c0_9 = arith.constant 0 : index
    %c0_10 = arith.constant 0 : index
    %13 = vector.load %arg5[%c0_9, %c0_10] : memref<1x64xf32, #tpu.memory_space<vmem>>, vector<1x64xf32>
    %14 = vector.broadcast %13 : vector<1x64xf32> to vector<32x64xf32>
    %15 = arith.addf %12, %14 : vector<32x64xf32>
    %cst_11 = arith.constant 0.000000e+00 : f32
    %16 = vector.broadcast %cst_11 : f32 to vector<32x64xf32>
    %17 = arith.maximumf %15, %16 : vector<32x64xf32>
    %c0_12 = arith.constant 0 : index
    %c0_13 = arith.constant 0 : index
    %18 = vector.load %arg6[%c0_12, %c0_13] : memref<64x192xf32, #tpu.memory_space<vmem>>, vector<64x192xf32>
    %19 = arith.truncf %17 : vector<32x64xf32> to vector<32x64xbf16>
    %20 = arith.truncf %18 : vector<64x192xf32> to vector<64x192xbf16>
    %cst_14 = arith.constant dense<0.000000e+00> : vector<32x192xf32>
    %21 = tpu.matmul %19, %20, %cst_14 {dimension_numbers = #tpu.dot_dimension_numbers<[1], [0], [0], [1], [0, 0, 1, 1], [], []>} : vector<32x64xbf16>, vector<64x192xbf16>, vector<32x192xf32> -> vector<32x192xf32>
    %c0_15 = arith.constant 0 : index
    %c0_16 = arith.constant 0 : index
    %22 = vector.load %arg7[%c0_15, %c0_16] : memref<1x192xf32, #tpu.memory_space<vmem>>, vector<1x192xf32>
    %23 = vector.broadcast %22 : vector<1x192xf32> to vector<32x192xf32>
    %24 = arith.addf %21, %23 : vector<32x192xf32>
    %c0_17 = arith.constant 0 : index
    %c0_18 = arith.constant 0 : index
    %25 = vector.load %arg8[%c0_17, %c0_18] : memref<32x192xf32, #tpu.memory_space<vmem>>, vector<32x192xf32>
    tpu.vector_store %arg8[%c0_17, %c0_18], %24 {strides = array<i32>} : memref<32x192xf32, #tpu.memory_space<vmem>>, vector<32x192xf32>,
    return
  }
  func.func @transform_0(%arg0: i32) -> (i32, i32) {
    %c0_i32 = arith.constant 0 : i32
    %c0_i32_0 = arith.constant 0 : i32
    return %arg0, %c0_i32 : i32, i32
  }
  func.func @transform_1(%arg0: i32) -> (i32, i32) {
    %c0_i32 = arith.constant 0 : i32
    %c0_i32_0 = arith.constant 0 : i32
    %c0_i32_1 = arith.constant 0 : i32
    return %c0_i32, %c0_i32_0 : i32, i32
  }
  func.func @transform_2(%arg0: i32) -> (i32, i32) {
    %c0_i32 = arith.constant 0 : i32
    %c0_i32_0 = arith.constant 0 : i32
    %c0_i32_1 = arith.constant 0 : i32
    return %c0_i32, %c0_i32_0 : i32, i32
  }
  func.func @transform_3(%arg0: i32) -> (i32, i32) {
    %c0_i32 = arith.constant 0 : i32
    %c0_i32_0 = arith.constant 0 : i32
    %c0_i32_1 = arith.constant 0 : i32
    return %c0_i32, %c0_i32_0 : i32, i32
  }
  func.func @transform_4(%arg0: i32) -> (i32, i32) {
    %c0_i32 = arith.constant 0 : i32
    %c0_i32_0 = arith.constant 0 : i32
    %c0_i32_1 = arith.constant 0 : i32
    return %c0_i32, %c0_i32_0 : i32, i32
  }
  func.func @transform_5(%arg0: i32) -> (i32, i32) {
    %c0_i32 = arith.constant 0 : i32
    %c0_i32_0 = arith.constant 0 : i32
    %c0_i32_1 = arith.constant 0 : i32
    return %c0_i32, %c0_i32_0 : i32, i32
  }
  func.func @transform_6(%arg0: i32) -> (i32, i32) {
    %c0_i32 = arith.constant 0 : i32
    %c0_i32_0 = arith.constant 0 : i32
    %c0_i32_1 = arith.constant 0 : i32
    return %c0_i32, %c0_i32_0 : i32, i32
  }
  func.func @transform_7(%arg0: i32) -> (i32, i32) {
    %c0_i32 = arith.constant 0 : i32
    %c0_i32_0 = arith.constant 0 : i32
    return %arg0, %c0_i32 : i32, i32
  }
}

</mosaic_0001>

<bundles_post_ra>
// kernel: tpu_custom_call.1
= control target key start
LH: loop header
LB: loop body
LE: loop exit
PB: predicated region body
PF: predicated region fallthrough
CT: control target
= control target key end

     0   :  { %12 = vsyncpa [#allocation3], 0  ;;  %s575_s0 = inlined_call_operand.vmem [shape: bf16[32,16], index: 0, kind: input, shape index: {}]   ;;  %s576_s1 = inlined_call_operand.hbm [shape: f32[16,32], index: 1, kind: input, shape index: {}]   ;;  %s577_s2 = inlined_call_operand.vmem [shape: f32[1,32], index: 2, kind: input, shape index: {}]   ;;  %s578_s3 = inlined_call_operand.vmem [shape: f32[32,64], index: 3, kind: input, shape index: {}]   ;;  %s579_s4 = inlined_call_operand.vmem [shape: f32[1,64], index: 4, kind: input, shape index: {}]   ;;  %s580_s5 = inlined_call_operand.hbm [shape: f32[64,192], index: 5, kind: input, shape index: {}]   ;;  %s581_s6 = inlined_call_operand.vmem [shape: f32[1,192], index: 6, kind: input, shape index: {}]   ;;  %s582_s7 = inlined_call_operand.hbm [shape: f32[32,192], index: 7, kind: output, shape index: {}]  }
   0x1   :  { %13 = vsyncpa [#allocation6], 0 }
   0x2   :  { %14 = vsyncpa [#allocation4], 0  ;;  %s452_s24 = smov [#allocation2]   ;;  %s380_s28 = scalar_lea.hbm %s576_s1, 256 }
   0x3   :  { %s22_s25 = sshll.u32 %s452_s24, 4  ;;  %p381_p0 = scmp.ne.s32.totalorder %s576_s1, %s380_s28  ;;  %s23_s25 = int_to_ptr.vmem [resolvable:$true] %s22_s25 }
   0x4   :  { %p384_p1 = scmp.lt.u32.totalorder %s380_s28, %s576_s1 }
   0x6   :  { %p386_p2 = pnand %p384_p1, %p381_p0 }
   0x8   :  { %389 = shalt.err (!%p386_p2)
}
   0x9   :  { %s390_s10 = scalar_lea.vmem %s23_s25, 256  ;;  %p395_p4 = scmp.lt.s32.totalorder %s23_s25, %s23_s25 }
   0xa   :  { %p391_p3 = scmp.ne.s32.totalorder %s23_s25, %s390_s10  ;;  %p396_p5 = scmp.lt.s32.totalorder %s390_s10, %s390_s10 }
   0xc   :  { %p397_p6 = por %p396_p5, %p395_p4 }
   0xe   :  { %p398_p7 = pnand %p397_p6, %p391_p3 }
  0x10   :  { %401 = shalt.err (!%p398_p7)
}
  0x11   :  { %s453_s11 = smov 128   ;;  %s454_s12 = smov 8  }
  0x12   :  { %28 = dma.hbm_to_vmem [thread:$0]  %s576_s1, 256, %s23_s25, [#allocation3], %s453_s11, %s453_s11, %s454_s12  }
  0x13   :  { %s455_s15 = smov [#allocation5]   ;;  %s402_s19 = scalar_lea.hbm %s580_s5, 2048 }
  0x14   :  { %s40_s16 = sshll.u32 %s455_s15, 4  ;;  %p403_p8 = scmp.ne.s32.totalorder %s580_s5, %s402_s19  ;;  %s41_s16 = int_to_ptr.vmem [resolvable:$true] %s40_s16 }
  0x15   :  { %p406_p9 = scmp.lt.u32.totalorder %s402_s19, %s580_s5 }
  0x17   :  { %p408_p10 = pnand %p406_p9, %p403_p8 }
  0x19   :  { %411 = shalt.err (!%p408_p10)
}
  0x1a   :  { %s412_s24 = scalar_lea.vmem %s41_s16, 2048  ;;  %p417_p12 = scmp.lt.s32.totalorder %s41_s16, %s41_s16 }
  0x1b   :  { %p413_p11 = scmp.ne.s32.totalorder %s41_s16, %s412_s24  ;;  %p418_p13 = scmp.lt.s32.totalorder %s412_s24, %s412_s24 }
  0x1d   :  { %p419_p0 = por %p418_p13, %p417_p12 }
  0x1f   :  { %p420_p1 = pnand %p419_p0, %p413_p11 }
  0x21   :  { %423 = shalt.err (!%p420_p1)
}
  0x22   :  { %s456_s1 = smov 256   ;;  %s457_s25 = smov 16  }
  0x23   :  { %46 = dma.hbm_to_vmem [thread:$0]  %s580_s5, 2048, %s41_s16, [#allocation6], %s456_s1, %s456_s1, %s457_s25  }
  0x24   :  { %446 = dma.done.wait [#allocation3], 256  }
  0x25   :  { %447 = vsyncadd [#allocation3], 4294967040 }
  0x26   :  { %448 = dma.done.wait [#allocation6], 2048  }
  0x27   :  { %449 = vsyncadd [#allocation6], 4294965248  ;;  %v60_v0 = vld [vmem:[#allocation2] sm:$0xff]  ;;  %v61_v1 = vld [vmem:[#allocation2 + $0x8] sm:$0xff]  ;;  %vm80_vm0 = vcmask 130048   ;;  %vm155_vm1 = vcmask 261120  }
  0x28   :  { %v62_v2 = vpack.c.bf16 %v61_v1, %v60_v0  ;;  %v378_v3 = vld [vmem:[%s575_s0] sm:$0xff]   ;;  %v379_v4 = vld [vmem:[%s575_s0 + $0x8] sm:$0xff]   ;;  %v142_v8 = vld [vmem:[%s578_s3 + $0x10] sm:$0xff]  ;;  %v458_v50 = vmov 0   ;;  %vm253_vm2 = vcmask 523264  }
  0x29   :  { %358 = vmatprep.mubr.msk.bf16.mxu1 %vm80_vm0, %v378_v3  ;;  %v140_v5 = vld [vmem:[%s578_s3] sm:$0xff]  ;;  %v141_v6 = vld [vmem:[%s578_s3 + $0x8] sm:$0xff]  ;;  %v143_v9 = vld [vmem:[%s578_s3 + $0x18] sm:$0xff]  ;;  %292 = vmatprep.mubr.bf16.mxu0 %v458_v50 }
  0x2a   :  { %356 = vmatprep.subr.bf16.mxu1 %v62_v2  ;;  %v146_v7 = vpack.c.bf16 %v141_v6, %v140_v5  ;;  %v147_v10 = vpack.c.bf16 %v143_v9, %v142_v8  ;;  %v216_v11 = vld [vmem:[#allocation5 + $0x8] sm:$0xff]  ;;  %v218_v12 = vld [vmem:[#allocation5 + $0x18] sm:$0xff]  ;;  %v215_v13 = vld [vmem:[#allocation5] sm:$0xff] }
  0x2b   :  { %357 = vmatpush3.bf16.msra.mxu1 %v62_v2  ;;  %v234_v14 = vpack.c.bf16 %v218_v12, %v216_v11  ;;  %v217_v15 = vld [vmem:[#allocation5 + $0x10] sm:$0xff]  ;;  %v220_v16 = vld [vmem:[#allocation5 + $0x28] sm:$0xff]  ;;  %v222_v17 = vld [vmem:[#allocation5 + $0x38] sm:$0xff]  ;;  %v243_v2 = vlaneseq }
  0x2c   :  { %362 = vmatprep.subr.bf16.mxu1 %v146_v7  ;;  %v233_v18 = vpack.c.bf16 %v217_v15, %v215_v13  ;;  %v236_v19 = vpack.c.bf16 %v222_v17, %v220_v16  ;;  %v219_v20 = vld [vmem:[#allocation5 + $0x20] sm:$0xff]  ;;  %v221_v21 = vld [vmem:[#allocation5 + $0x30] sm:$0xff]  ;;  %v224_v38 = vld [vmem:[#allocation5 + $0x48] sm:$0xff] }
  0x2d   :  { %260 = vmatprep.subr.bf16.mxu0 %v234_v14  ;;  %v235_v22 = vpack.c.bf16 %v221_v21, %v219_v20  ;;  %v339_v23 = vld [vmem:[%s577_s2] ss:$0 sm:$0xff]  ;;  %v226_v39 = vld [vmem:[#allocation5 + $0x58] sm:$0xff]  ;;  %v223_v41 = vld [vmem:[#allocation5 + $0x40] sm:$0xff]  ;;  %v244_v3 = vshrl.u32 %v243_v2, 7 }
  0x2e   :  { %359 = vmatmul.mubr.msk.bf16.vlgmr.msra.gmra.mrb[0].mxu1 %vm80_vm0, %v379_v4  ;;  %261 = vmatpush1.bf16.msra.mxu0 %v233_v18  ;;  %v238_v40 = vpack.c.bf16 %v226_v39, %v224_v38  ;;  %v225_v42 = vld [vmem:[#allocation5 + $0x50] sm:$0xff]  ;;  %v228_v44 = vld [vmem:[#allocation5 + $0x68] sm:$0xff]  ;;  %v230_v45 = vld [vmem:[#allocation5 + $0x78] sm:$0xff] }
  0x2f   :  { %363 = vmatpush3.bf16.msra.mxu1 %v146_v7  ;;  %262 = vmatprep.subr.bf16.mxu0 %v236_v19  ;;  %v237_v43 = vpack.c.bf16 %v225_v42, %v223_v41  ;;  %v240_v46 = vpack.c.bf16 %v230_v45, %v228_v44  ;;  %v227_v47 = vld [vmem:[#allocation5 + $0x60] sm:$0xff]  ;;  %v229_v48 = vld [vmem:[#allocation5 + $0x70] sm:$0xff]  ;;  %v245_v4 = vsub.s32 0, %v244_v3  ;;  %v249_v6 = vsub.s32 1, %v244_v3 }
  0x30   :  { %364 = vmatprep.subr.bf16.mxu1 %v147_v10  ;;  %v239_v49 = vpack.c.bf16 %v229_v48, %v227_v47  ;;  %v344_v51 = vld [vmem:[%s579_s4] ss:$0 sm:$0xff] }
  0x31   :  { %v241_v5 = vld [vmem:[%s581_s6] sm:$0x3]  ;;  %s459_s6 = smov [#allocation7]  }
  0x32   :  { %263 = vmatpush1.bf16.msra.mxu0 %v235_v22  ;;  %v246_v7 = vrot.slane %v241_v5, %v245_v4  ;;  %v250_v8 = vrot.slane %v241_v5, %v249_v6  ;;  %s326_s18 = sshll.u32 %s459_s6, 4  ;;  %s327_s18 = int_to_ptr.vmem [resolvable:$true] %s326_s18 }
  0x33   :  { %365 = vmatpush3.bf16.msra.mxu1 %v147_v10  ;;  %264 = vmatprep.subr.bf16.mxu0 %v238_v40  ;;  %s424_s19 = scalar_lea.vmem %s327_s18, 1024  ;;  %p429_p3 = scmp.lt.s32.totalorder %s327_s18, %s327_s18 }
  0x34   :  { %p425_p2 = scmp.ne.s32.totalorder %s327_s18, %s424_s19  ;;  %p430_p4 = scmp.lt.s32.totalorder %s424_s19, %s424_s19 }
  0x36   :  { %265 = vmatpush1.bf16.msra.mxu0 %v237_v43  ;;  %p431_p5 = por %p430_p4, %p429_p3 }
  0x37   :  { %266 = vmatprep.subr.bf16.mxu0 %v240_v46 }
  0x38   :  { %p432_p6 = pnand %p431_p5, %p425_p2 }
  0x3a   :  { %267 = vmatpush1.bf16.msra.mxu0 %v239_v49 }
 0x101   :  { %v360_v24 = vpop.f32.mrb[0].mxu1 }
 0x102   :  { %v130_v25 = vadd.f32 %v360_v24, %v339_v23  ;;  %v121_v26 = vpop.f32.mrb[1].mxu1 }
 0x103   :  { %v122_v27 = vadd.f32 %v339_v23, %v121_v26  ;;  %v361_v28 = vpop.f32.mrb[2].mxu1 }
 0x104   :  { %v133_v29 = vadd.f32 %v361_v28, %v339_v23  ;;  %v124_v30 = vpop.f32.mrb[3].mxu1  ;;  %v138_v32 = vmax.f32 %v130_v25, 0.0 }
 0x105   :  { %v125_v31 = vadd.f32 %v339_v23, %v124_v30  ;;  %v136_v34 = vmax.f32 %v122_v27, 0.0 }
 0x106   :  { %v139_v33 = vmax.f32 %v133_v29, 0.0 }
 0x107   :  { %v137_v35 = vmax.f32 %v125_v31, 0.0 }
 0x108   :  { %v145_v36 = vpack.c.bf16 %v139_v33, %v138_v32 }
 0x109   :  { %v144_v37 = vpack.c.bf16 %v137_v35, %v136_v34 }
 0x10b   :  { %366 = vmatprep.mubr.msk.bf16.mxu1 %vm155_vm1, %v144_v37 }
 0x10c   :  { %367 = vmatmul.mubr.msk.bf16.vlgmr.msra.gmra.mrb[4].mxu1 %vm155_vm1, %v145_v36 }
 0x1df   :  { %v368_v52 = vpop.f32.mrb[4].mxu1 }
 0x1e0   :  { %v205_v53 = vadd.f32 %v368_v52, %v344_v51  ;;  %v196_v54 = vpop.f32.mrb[5].mxu1 }
 0x1e1   :  { %v197_v55 = vadd.f32 %v344_v51, %v196_v54  ;;  %v369_v56 = vpop.f32.mrb[6].mxu1 }
 0x1e2   :  { %v208_v57 = vadd.f32 %v369_v56, %v344_v51  ;;  %v199_v58 = vpop.f32.mrb[7].mxu1  ;;  %v213_v60 = vmax.f32 %v205_v53, 0.0 }
 0x1e3   :  { %v200_v59 = vadd.f32 %v344_v51, %v199_v58  ;;  %v211_v62 = vmax.f32 %v197_v55, 0.0 }
 0x1e4   :  { %v214_v61 = vmax.f32 %v208_v57, 0.0 }
 0x1e5   :  { %v212_v63 = vmax.f32 %v200_v59, 0.0 }
 0x1e6   :  { %v232_v0 = vpack.c.bf16 %v214_v61, %v213_v60 }
 0x1e7   :  { %v231_v1 = vpack.c.bf16 %v212_v63, %v211_v62 }
 0x1e9   :  { %347 = vmatmul.mubr.msk.bf16.vlgmr.msra.gmra.mrb[0].mxu0 %vm253_vm2, %v231_v1 }
 0x1ea   :  { %302 = vmatprep.mubr.bf16.mxu0 %v458_v50 }
 0x1f1   :  { %348 = vmatmul.mubr.msk.bf16.gmra.mrb[4].mxu0 %vm253_vm2, %v232_v0 }
 0x2bc   :  { %v294_v9 = vpop.f32.mrb[0].mxu0 }
 0x2bd   :  { %v295_v10 = vadd.f32 %v294_v9, %v246_v7  ;;  %v296_v11 = vpop.f32.mrb[1].mxu0 }
 0x2be   :  { %v297_v12 = vadd.f32 %v296_v11, %v250_v8  ;;  %v298_v13 = vpop.f32.mrb[2].mxu0 }
 0x2bf   :  { %313 = vst [vmem:[#allocation7] sm:$0xff] %v295_v10  ;;  %v299_v14 = vadd.f32 %v298_v13, %v246_v7  ;;  %v300_v15 = vpop.f32.mrb[3].mxu0 }
 0x2c0   :  { %314 = vst.msk [vmem:[#allocation7 + $0x8] sm:$0xff] %vm253_vm2, %v297_v12  ;;  %v301_v16 = vadd.f32 %v300_v15, %v250_v8 }
 0x2c1   :  { %315 = vst [vmem:[#allocation7 + $0x10] sm:$0xff] %v299_v14 }
 0x2c2   :  { %316 = vst.msk [vmem:[#allocation7 + $0x18] sm:$0xff] %vm253_vm2, %v301_v16 }
 0x2c4   :  { %v304_v17 = vpop.f32.mrb[4].mxu0 }
 0x2c5   :  { %v305_v18 = vadd.f32 %v304_v17, %v246_v7  ;;  %v306_v19 = vpop.f32.mrb[5].mxu0 }
 0x2c6   :  { %v307_v20 = vadd.f32 %v306_v19, %v250_v8  ;;  %v308_v21 = vpop.f32.mrb[6].mxu0 }
 0x2c7   :  { %317 = vst [vmem:[#allocation7 + $0x20] sm:$0xff] %v305_v18  ;;  %v309_v22 = vadd.f32 %v308_v21, %v246_v7  ;;  %v310_v23 = vpop.f32.mrb[7].mxu0 }
 0x2c8   :  { %318 = vst.msk [vmem:[#allocation7 + $0x28] sm:$0xff] %vm253_vm2, %v307_v20  ;;  %v311_v24 = vadd.f32 %v310_v23, %v250_v8 }
 0x2c9   :  { %319 = vst [vmem:[#allocation7 + $0x30] sm:$0xff] %v309_v22 }
 0x2ca   :  { %320 = vst.msk [vmem:[#allocation7 + $0x38] sm:$0xff] %vm253_vm2, %v311_v24 }
 0x2cb   :  { %435 = shalt.err (!%p432_p6)
}
 0x2cc   :  { %s436_s22 = scalar_lea.hbm %s582_s7, 1024 }
 0x2cd   :  { %p437_p7 = scmp.ne.s32.totalorder %s582_s7, %s436_s22  ;;  %p440_p8 = scmp.lt.u32.totalorder %s436_s22, %s582_s7 }
 0x2cf   :  { %p442_p9 = pnand %p440_p8, %p437_p7 }
 0x2d1   :  { %445 = shalt.err (!%p442_p9)
}
 0x2d2   :  { %332 = dma.vmem_to_hbm [thread:$0]  %s327_s18, 1024, %s582_s7, [#allocation4], %s456_s1, %s456_s1, %s457_s25  }
 0x2d3   :  { %450 = dma.done.wait [#allocation4], 1024  }
 0x2d4   :  { %451 = vsyncadd [#allocation4], 4294966272 }
 0x2d5   :  { %336 = vsyncpa [#allocation3], 1 }
 0x2d6   :  { %337 = vsyncpa [#allocation6], 1 }
 0x2d7   :  { %338 = vsyncpa [#allocation4], 1 }

</bundles_post_ra>
